<compile_context>
chip_gen: v7x
topology: tpu7x:2x2x1
jax: 0.10.0
libtpu: 0.0.40
codegen_flags: <defaults>
</compile_context>

<pallas_src>
from itertools import permutations

import jax
import jax.numpy as jnp
from jax import lax
from jax.experimental import pallas as pl
from jax.experimental.pallas import tpu as pltpu  # noqa: F401


# --------------------------------------------------------------------------
# Fused kernel: RNN recurrence + deep-set phi (x2) + rho Q-heads (x2)
# --------------------------------------------------------------------------
def fused_critic_kernel(xp_ref,        # (T*Bp, E)  f32  pre-projected tokens + bias (time-major)
                        whh_ref,       # (E, E)     f32
                        body_act_ref,  # (Bp, D_ba) bf16 [obs_body, act]
                        pairs_ref,     # (P*Bp, D_pair) bf16 stacked object pairs (pair-major)
                        w1l_ref,       # (E, 2H)    bf16 fused phi L1, language rows
                        w1ba_ref,      # (D_ba, 2H) bf16 fused phi L1, body/act rows
                        w1p_ref,       # (D_pair, 2H) bf16 fused phi L1, pair rows
                        b1_ref,        # (1, 2H)    f32
                        w2_ref,        # (2H, 2*Dphi) bf16 block-diagonal
                        b2_ref,        # (1, 2*Dphi)  f32
                        r1_ref,        # (2*Dphi, 2H) bf16 block-diagonal
                        rb1_ref,       # (1, 2H)      f32
                        r2t_ref,       # (2*Dout, 2H) bf16 final rho layer, TRANSPOSED
                        rb2_ref,       # (1, 2*Dout)  f32
                        q_ref):        # (Bp, 2*Dout) f32 output [q1 | q2]
    Bp = body_act_ref.shape[0]
    T = xp_ref.shape[0] // Bp
    P = pairs_ref.shape[0] // Bp

    # --- tanh-RNN recurrence (f32). Input projection + bias were folded on
    # the host, so the serial chain is only h @ W_hh -> add -> tanh. ----------
    xp = xp_ref[...]                    # loaded once, sliced from vregs below
    whh = whh_ref[...]
    h = jnp.zeros((Bp, whh.shape[0]), jnp.float32)
    for t in range(T):                  # T small & static -> fully unrolled
        h = jnp.tanh(xp[t * Bp:(t + 1) * Bp, :]
                     + jnp.dot(h, whh, preferred_element_type=jnp.float32))
    h_b = h.astype(jnp.bfloat16)

    # --- fused phi layer 1: shared ([l_emb, body, act]) part once per row ----
    shared = (jnp.dot(h_b, w1l_ref[...], preferred_element_type=jnp.float32)
              + jnp.dot(body_act_ref[...], w1ba_ref[...],
                        preferred_element_type=jnp.float32)
              + b1_ref[...])                                     # (Bp, 2H) f32

    # Pair contribution for all P*Bp rows in ONE matmul, then a broadcast-add
    # of `shared` onto each 8-aligned pair block (replaces the old sel@shared
    # replication matmul -> pure VPU work that co-issues with the MXU).
    pair_dot = jnp.dot(pairs_ref[...], w1p_ref[...],
                       preferred_element_type=jnp.float32)       # (P*Bp, 2H)
    h1 = jnp.concatenate(
        [jnp.maximum(pair_dot[p * Bp:(p + 1) * Bp, :] + shared, 0.0)
         for p in range(P)], axis=0).astype(jnp.bfloat16)        # (P*Bp, 2H)

    # --- fused phi layer 2 (block-diagonal twin heads), one matmul -----------
    o = jnp.maximum(jnp.dot(h1, w2_ref[...],
                            preferred_element_type=jnp.float32)
                    + b2_ref[...], 0.0)                          # (P*Bp, 2*Dphi)

    # --- deep-set sum over the P ordered pairs (8-aligned slice-accumulate) --
    acc = o[0:Bp, :]
    for p in range(1, P):
        acc = acc + o[p * Bp:(p + 1) * Bp, :]                    # (Bp, 2*Dphi)

    # --- fused rho Q-heads (block-diagonal) ----------------------------------
    z = jnp.maximum(jnp.dot(acc.astype(jnp.bfloat16), r1_ref[...],
                            preferred_element_type=jnp.float32)
                    + rb1_ref[...], 0.0)                         # (Bp, 2H)
    # Final layer kept transposed (2*Dout, 2H): contract the 2H axis of both
    # operands instead of DMAing a (512, 2) tile-padded matrix.
    q = lax.dot_general(z.astype(jnp.bfloat16), r2t_ref[...],
                        dimension_numbers=(((1,), (1,)), ((), ())),
                        preferred_element_type=jnp.float32)      # (Bp, 2*Dout)
    q_ref[...] = q + rb2_ref[...]


# --------------------------------------------------------------------------
# Wrapper module
# --------------------------------------------------------------------------
def _uniform(key, shape, bound):
    return jax.random.uniform(key, shape, jnp.float32, -bound, bound)


def _block_diag(a, b):
    r1, c1 = a.shape
    r2, c2 = b.shape
    out = jnp.zeros((r1 + r2, c1 + c2), a.dtype)
    out = out.at[:r1, :c1].set(a)
    out = out.at[r1:, c1:].set(b)
    return out


def _round_up(n, m):
    return ((n + m - 1) // m) * m


class LanguageCriticPallas:
    def __init__(self, nb_objects, dim_phi_critic_input, dim_phi_critic_output,
                 dim_rho_critic_input, dim_rho_critic_output, one_hot_language,
                 vocab_size, embedding_size, nb_permutations, dim_body, dim_object,
                 key):
        self.nb_objects = nb_objects
        self.dim_body = dim_body
        self.dim_object = dim_object
        self.one_hot_language = one_hot_language
        self.nb_permutations = nb_permutations
        self.vocab_size = vocab_size
        self.embedding_size = embedding_size
        self.dim_phi_out = dim_phi_critic_output
        self.dim_rho_out = dim_rho_critic_output

        # Reviewer-flagged implicit assumption of the block-diagonal rho fuse.
        assert dim_rho_critic_input == dim_phi_critic_output, (
            "fused rho heads require dim_rho_critic_input == dim_phi_critic_output")

        self.one_hot_encodings = [
            jnp.array([1.0, 0.0, 0.0], jnp.float32),
            jnp.array([0.0, 1.0, 0.0], jnp.float32),
            jnp.array([0.0, 0.0, 1.0], jnp.float32),
        ]

        hid = 256
        # Column split of the phi input: [l_emb (E) | body+act (D_ba) | pair (D_pair)]
        self.d_pair = 2 * (nb_objects + dim_object)
        self.d_ba = dim_phi_critic_input - embedding_size - self.d_pair
        assert self.d_ba > 0

        ks = jax.random.split(key, 24)

        # RNN parameters (torch-style uniform init, bound = 1/sqrt(hidden)).
        kr = 1.0 / jnp.sqrt(embedding_size)
        self.w_ih = _uniform(ks[0], (vocab_size, embedding_size), kr)
        self.w_hh = _uniform(ks[1], (embedding_size, embedding_size), kr)
        self.rnn_b = (_uniform(ks[2], (1, embedding_size), kr)
                      + _uniform(ks[3], (1, embedding_size), kr))

        # PhiCriticDeepSet: two parallel (Din -> 256 -> Dphi) ReLU MLPs.
        k1 = 1.0 / jnp.sqrt(dim_phi_critic_input)
        k2 = 1.0 / jnp.sqrt(hid)
        phi_w1 = _uniform(ks[4], (dim_phi_critic_input, hid), k1)
        phi_b1 = _uniform(ks[5], (1, hid), k1)
        phi_w2 = _uniform(ks[6], (hid, dim_phi_critic_output), k2)
        phi_b2 = _uniform(ks[7], (1, dim_phi_critic_output), k2)
        phi_w1b = _uniform(ks[8], (dim_phi_critic_input, hid), k1)
        phi_b1b = _uniform(ks[9], (1, hid), k1)
        phi_w2b = _uniform(ks[10], (hid, dim_phi_critic_output), k2)
        phi_b2b = _uniform(ks[11], (1, dim_phi_critic_output), k2)

        # RhoCriticDeepSet: two parallel (Dphi -> 256 -> out) heads.
        k3 = 1.0 / jnp.sqrt(dim_rho_critic_input)
        rho_w1 = _uniform(ks[12], (dim_rho_critic_input, hid), k3)
        rho_b1 = _uniform(ks[13], (1, hid), k3)
        rho_w2 = _uniform(ks[14], (hid, dim_rho_critic_output), k2)
        rho_b2 = _uniform(ks[15], (1, dim_rho_critic_output), k2)
        rho_w1b = _uniform(ks[16], (dim_rho_critic_input, hid), k3)
        rho_b1b = _uniform(ks[17], (1, hid), k3)
        rho_w2b = _uniform(ks[18], (hid, dim_rho_critic_output), k2)
        rho_b2b = _uniform(ks[19], (1, dim_rho_critic_output), k2)

        # ---- Fuse the twin double-Q MLPs into lane-aligned matmuls ----------
        # Large weights are stored bf16 (halves DMA + VMEM); biases stay f32
        # since they're added into f32 accumulators.
        E = embedding_size
        w1_cat = jnp.concatenate([phi_w1, phi_w1b], axis=1)                 # (Din, 2H)
        self.w1_lang = w1_cat[:E].astype(jnp.bfloat16)                      # (E, 2H)
        self.w1_ba = w1_cat[E:E + self.d_ba].astype(jnp.bfloat16)           # (D_ba, 2H)
        self.w1_pair = w1_cat[E + self.d_ba:].astype(jnp.bfloat16)          # (D_pair, 2H)
        self.b1_cat = jnp.concatenate([phi_b1, phi_b1b], axis=1)            # (1, 2H)
        self.w2_bd = _block_diag(phi_w2, phi_w2b).astype(jnp.bfloat16)      # (2H, 2*Dphi)
        self.b2_cat = jnp.concatenate([phi_b2, phi_b2b], axis=1)            # (1, 2*Dphi)

        self.r1_bd = _block_diag(rho_w1, rho_w1b).astype(jnp.bfloat16)      # (2*Dphi, 2H)
        self.rb1_cat = jnp.concatenate([rho_b1, rho_b1b], axis=1)           # (1, 2H)
        # Final rho layer stored transposed: (2*Dout, 2H) instead of (2H, 2*Dout).
        self.r2t_bd = _block_diag(rho_w2, rho_w2b).T.astype(jnp.bfloat16)   # (2*Dout, 2H)
        self.rb2_cat = jnp.concatenate([rho_b2, rho_b2b], axis=1)           # (1, 2*Dout)

        # Jit the whole device-side forward for a fixed batch size.
        self._forward_jit = jax.jit(self._forward_impl)

    # ------------------------------------------------------------------
    def _forward_impl(self, obs, act, enc):
        """enc: (B, T, V) one-hot token encodings (already looked up on host)."""
        B = obs.shape[0]
        Bp = _round_up(B, 8)          # sublane-align all M dimensions
        T = enc.shape[1]

        # RNN input projection + bias folded OUT of the serial recurrence:
        # one batched matmul here, only h @ W_hh remains on the critical path.
        xp = jnp.einsum('btv,ve->bte', enc, self.w_ih) + self.rnn_b      # (B, T, E)
        xp = jnp.transpose(xp, (1, 0, 2))                                # time-major
        xp = jnp.pad(xp, ((0, 0), (0, Bp - B), (0, 0)))
        xp = xp.reshape(T * Bp, self.embedding_size)                     # (T*Bp, E)

        obs_body = obs[:, :self.dim_body]
        body_act = jnp.concatenate([obs_body, act], axis=1)              # (B, D_ba)
        body_act = jnp.pad(body_act, ((0, Bp - B), (0, 0))).astype(jnp.bfloat16)

        obs_objects = []
        for i in range(self.nb_objects):
            oh = jnp.tile(self.one_hot_encodings[i][None, :], (B, 1))
            sl = obs[:, self.dim_body + self.dim_object * i:
                        self.dim_body + self.dim_object * (i + 1)]
            obs_objects.append(jnp.concatenate([oh, sl], axis=1))

        # Pair-major stacking, same ordering as torch.stack over permutations:
        # rows [p*Bp:(p+1)*Bp] hold ordered pair p for the (padded) batch.
        pairs = jnp.stack([jnp.concatenate([x0, x1], axis=1)
                           for x0, x1 in permutations(obs_objects, 2)])  # (P, B, D_pair)
        P = pairs.shape[0]
        pairs = jnp.pad(pairs, ((0, 0), (0, Bp - B), (0, 0)))
        pairs = pairs.reshape(P * Bp, self.d_pair).astype(jnp.bfloat16)

        # Single fused, no-grid kernel (footprint << VMEM at these shapes).
        # For large batches, add a batch-chunk grid with constant-index weight
        # BlockSpecs (weights VMEM-resident) and dimension_semantics=("parallel",)
        # to fill the MXU M dimension and both v7x TensorCores.
        q = pl.pallas_call(
            fused_critic_kernel,
            out_shape=jax.ShapeDtypeStruct((Bp, 2 * self.dim_rho_out), jnp.float32),
        )(xp, self.w_hh, body_act, pairs,
          self.w1_lang, self.w1_ba, self.w1_pair, self.b1_cat,
          self.w2_bd, self.b2_cat,
          self.r1_bd, self.rb1_cat, self.r2t_bd, self.rb2_cat)
        return q

    # ------------------------------------------------------------------
    def forward(self, obs, act, language_goals):
        # TODO(synk): the Python string -> encoding dict lookup has no device
        # equivalent; it stays host-side, everything after it is jitted.
        B = obs.shape[0]
        assert B == len(language_goals)
        enc = jnp.stack([self.one_hot_language[lg] for lg in language_goals]
                        ).astype(jnp.float32)                            # (B, T, V)
        q = self._forward_jit(obs, act, enc)                             # (Bp, 2*Dout)
        q1 = q[:B, :self.dim_rho_out]
        q2 = q[:B, self.dim_rho_out:]
        return q1, q2


# --------------------------------------------------------------------------
if __name__ == "__main__":
    # Small, self-consistent shapes.
    nb_objects = 3
    dim_body = 10
    dim_object = 15
    dim_act = 4
    vocab_size = 10
    embedding_size = 32
    seq_len = 6
    dim_phi_critic_output = 64
    dim_rho_critic_output = 1
    nb_permutations = len(list(permutations(range(nb_objects), 2)))  # 6
    dim_phi_critic_input = (embedding_size + dim_body + dim_act
                            + 2 * (nb_objects + dim_object))          # 82
    dim_rho_critic_input = dim_phi_critic_output

    # Synthetic "one_hot_language": sentence -> (seq_len, vocab) one-hot tokens.
    def sentence(token_ids):
        return jax.nn.one_hot(jnp.array(token_ids), vocab_size, dtype=jnp.float32)

    one_hot_language = {
        "grasp red":          sentence([1, 3, 5, 7, 2, 0]),
        "put blue on green":  sentence([2, 4, 6, 8, 9, 1]),
    }

    key = jax.random.PRNGKey(0)
    k_obs, k_act, k_params = jax.random.split(key, 3)

    batch = 2
    obs = jax.random.normal(k_obs, (batch, dim_body + nb_objects * dim_object),
                            jnp.float32)                               # (2, 55)
    act = jax.random.normal(k_act, (batch, dim_act), jnp.float32)      # (2, 4)
    language_goals = ["grasp red", "put blue on green"]

    critic = LanguageCriticPallas(
        nb_objects, dim_phi_critic_input, dim_phi_critic_output,
        dim_rho_critic_input, dim_rho_critic_output, one_hot_language,
        vocab_size, embedding_size, nb_permutations, dim_body, dim_object,
        key=k_params)

    q1, q2 = critic.forward(obs, act, language_goals)
    jax.block_until_ready((q1, q2))
    assert q1.shape == (batch, dim_rho_critic_output)
    assert q2.shape == (batch, dim_rho_critic_output)
    print("KERNEL_OK")
</pallas_src>

<mosaic_0001>
module attributes {stable_mosaic.version = 11 : i64} {
  func.func @fused_critic_kernel(%arg0: memref<48x32xf32, #tpu.memory_space<vmem>>, %arg1: memref<32x32xf32, #tpu.memory_space<vmem>>, %arg2: memref<8x14xbf16, #tpu.memory_space<vmem>>, %arg3: memref<48x36xbf16, #tpu.memory_space<vmem>>, %arg4: memref<32x512xbf16, #tpu.memory_space<vmem>>, %arg5: memref<14x512xbf16, #tpu.memory_space<vmem>>, %arg6: memref<36x512xbf16, #tpu.memory_space<vmem>>, %arg7: memref<1x512xf32, #tpu.memory_space<vmem>>, %arg8: memref<512x128xbf16, #tpu.memory_space<vmem>>, %arg9: memref<1x128xf32, #tpu.memory_space<vmem>>, %arg10: memref<128x512xbf16, #tpu.memory_space<vmem>>, %arg11: memref<1x512xf32, #tpu.memory_space<vmem>>, %arg12: memref<2x512xbf16, #tpu.memory_space<vmem>>, %arg13: memref<1x2xf32, #tpu.memory_space<vmem>>, %arg14: memref<8x2xf32, #tpu.memory_space<vmem>>) attributes {dimension_semantics = [], scalar_prefetch = 0 : i64, scratch_operands = 0 : i64, tpu.core_type = #tpu.core_type<tc>} {
    %c0 = arith.constant 0 : index
    %c0_0 = arith.constant 0 : index
    %0 = vector.load %arg0[%c0, %c0_0] : memref<48x32xf32, #tpu.memory_space<vmem>>, vector<48x32xf32>
    %c0_1 = arith.constant 0 : index
    %c0_2 = arith.constant 0 : index
    %1 = vector.load %arg1[%c0_1, %c0_2] : memref<32x32xf32, #tpu.memory_space<vmem>>, vector<32x32xf32>
    %cst = arith.constant 0.000000e+00 : f32
    %2 = vector.broadcast %cst : f32 to vector<8x32xf32>
    %3 = vector.extract_strided_slice %0 {offsets = [0, 0], sizes = [8, 32], strides = [1, 1]} : vector<48x32xf32> to vector<8x32xf32>
    %cst_3 = arith.constant dense<0.000000e+00> : vector<8x32xf32>
    %4 = tpu.matmul %2, %1, %cst_3 {dimension_numbers = #tpu.dot_dimension_numbers<[1], [0], [0], [1], [0, 0, 1, 1], [], []>} : vector<8x32xf32>, vector<32x32xf32>, vector<8x32xf32> -> vector<8x32xf32>
    %5 = arith.addf %3, %4 : vector<8x32xf32>
    %6 = math.tanh %5 : vector<8x32xf32>
    %7 = vector.extract_strided_slice %0 {offsets = [8, 0], sizes = [8, 32], strides = [1, 1]} : vector<48x32xf32> to vector<8x32xf32>
    %cst_4 = arith.constant dense<0.000000e+00> : vector<8x32xf32>
    %8 = tpu.matmul %6, %1, %cst_4 {dimension_numbers = #tpu.dot_dimension_numbers<[1], [0], [0], [1], [0, 0, 1, 1], [], []>} : vector<8x32xf32>, vector<32x32xf32>, vector<8x32xf32> -> vector<8x32xf32>
    %9 = arith.addf %7, %8 : vector<8x32xf32>
    %10 = math.tanh %9 : vector<8x32xf32>
    %11 = vector.extract_strided_slice %0 {offsets = [16, 0], sizes = [8, 32], strides = [1, 1]} : vector<48x32xf32> to vector<8x32xf32>
    %cst_5 = arith.constant dense<0.000000e+00> : vector<8x32xf32>
    %12 = tpu.matmul %10, %1, %cst_5 {dimension_numbers = #tpu.dot_dimension_numbers<[1], [0], [0], [1], [0, 0, 1, 1], [], []>} : vector<8x32xf32>, vector<32x32xf32>, vector<8x32xf32> -> vector<8x32xf32>
    %13 = arith.addf %11, %12 : vector<8x32xf32>
    %14 = math.tanh %13 : vector<8x32xf32>
    %15 = vector.extract_strided_slice %0 {offsets = [24, 0], sizes = [8, 32], strides = [1, 1]} : vector<48x32xf32> to vector<8x32xf32>
    %cst_6 = arith.constant dense<0.000000e+00> : vector<8x32xf32>
    %16 = tpu.matmul %14, %1, %cst_6 {dimension_numbers = #tpu.dot_dimension_numbers<[1], [0], [0], [1], [0, 0, 1, 1], [], []>} : vector<8x32xf32>, vector<32x32xf32>, vector<8x32xf32> -> vector<8x32xf32>
    %17 = arith.addf %15, %16 : vector<8x32xf32>
    %18 = math.tanh %17 : vector<8x32xf32>
    %19 = vector.extract_strided_slice %0 {offsets = [32, 0], sizes = [8, 32], strides = [1, 1]} : vector<48x32xf32> to vector<8x32xf32>
    %cst_7 = arith.constant dense<0.000000e+00> : vector<8x32xf32>
    %20 = tpu.matmul %18, %1, %cst_7 {dimension_numbers = #tpu.dot_dimension_numbers<[1], [0], [0], [1], [0, 0, 1, 1], [], []>} : vector<8x32xf32>, vector<32x32xf32>, vector<8x32xf32> -> vector<8x32xf32>
    %21 = arith.addf %19, %20 : vector<8x32xf32>
    %22 = math.tanh %21 : vector<8x32xf32>
    %23 = vector.extract_strided_slice %0 {offsets = [40, 0], sizes = [8, 32], strides = [1, 1]} : vector<48x32xf32> to vector<8x32xf32>
    %cst_8 = arith.constant dense<0.000000e+00> : vector<8x32xf32>
    %24 = tpu.matmul %22, %1, %cst_8 {dimension_numbers = #tpu.dot_dimension_numbers<[1], [0], [0], [1], [0, 0, 1, 1], [], []>} : vector<8x32xf32>, vector<32x32xf32>, vector<8x32xf32> -> vector<8x32xf32>
    %25 = arith.addf %23, %24 : vector<8x32xf32>
    %26 = math.tanh %25 : vector<8x32xf32>
    %27 = arith.truncf %26 : vector<8x32xf32> to vector<8x32xbf16>
    %c0_9 = arith.constant 0 : index
    %c0_10 = arith.constant 0 : index
    %28 = vector.load %arg4[%c0_9, %c0_10] : memref<32x512xbf16, #tpu.memory_space<vmem>>, vector<32x512xbf16>
    %cst_11 = arith.constant dense<0.000000e+00> : vector<8x512xf32>
    %29 = tpu.matmul %27, %28, %cst_11 {dimension_numbers = #tpu.dot_dimension_numbers<[1], [0], [0], [1], [0, 0, 1, 1], [], []>} : vector<8x32xbf16>, vector<32x512xbf16>, vector<8x512xf32> -> vector<8x512xf32>
    %c0_12 = arith.constant 0 : index
    %c0_13 = arith.constant 0 : index
    %30 = vector.load %arg2[%c0_12, %c0_13] : memref<8x14xbf16, #tpu.memory_space<vmem>>, vector<8x14xbf16>
    %c0_14 = arith.constant 0 : index
    %c0_15 = arith.constant 0 : index
    %31 = vector.load %arg5[%c0_14, %c0_15] : memref<14x512xbf16, #tpu.memory_space<vmem>>, vector<14x512xbf16>
    %cst_16 = arith.constant dense<0.000000e+00> : vector<8x512xf32>
    %32 = tpu.matmul %30, %31, %cst_16 {dimension_numbers = #tpu.dot_dimension_numbers<[1], [0], [0], [1], [0, 0, 1, 1], [], []>} : vector<8x14xbf16>, vector<14x512xbf16>, vector<8x512xf32> -> vector<8x512xf32>
    %33 = arith.addf %29, %32 : vector<8x512xf32>
    %c0_17 = arith.constant 0 : index
    %c0_18 = arith.constant 0 : index
    %34 = vector.load %arg7[%c0_17, %c0_18] : memref<1x512xf32, #tpu.memory_space<vmem>>, vector<1x512xf32>
    %35 = vector.broadcast %34 : vector<1x512xf32> to vector<8x512xf32>
    %36 = arith.addf %33, %35 : vector<8x512xf32>
    %c0_19 = arith.constant 0 : index
    %c0_20 = arith.constant 0 : index
    %37 = vector.load %arg3[%c0_19, %c0_20] : memref<48x36xbf16, #tpu.memory_space<vmem>>, vector<48x36xbf16>
    %c0_21 = arith.constant 0 : index
    %c0_22 = arith.constant 0 : index
    %38 = vector.load %arg6[%c0_21, %c0_22] : memref<36x512xbf16, #tpu.memory_space<vmem>>, vector<36x512xbf16>
    %cst_23 = arith.constant dense<0.000000e+00> : vector<48x512xf32>
    %39 = tpu.matmul %37, %38, %cst_23 {dimension_numbers = #tpu.dot_dimension_numbers<[1], [0], [0], [1], [0, 0, 1, 1], [], []>} : vector<48x36xbf16>, vector<36x512xbf16>, vector<48x512xf32> -> vector<48x512xf32>
    %40 = vector.extract_strided_slice %39 {offsets = [0, 0], sizes = [8, 512], strides = [1, 1]} : vector<48x512xf32> to vector<8x512xf32>
    %41 = arith.addf %40, %36 : vector<8x512xf32>
    %cst_24 = arith.constant 0.000000e+00 : f32
    %42 = vector.broadcast %cst_24 : f32 to vector<8x512xf32>
    %43 = arith.maximumf %41, %42 : vector<8x512xf32>
    %44 = vector.extract_strided_slice %39 {offsets = [8, 0], sizes = [8, 512], strides = [1, 1]} : vector<48x512xf32> to vector<8x512xf32>
    %45 = arith.addf %44, %36 : vector<8x512xf32>
    %cst_25 = arith.constant 0.000000e+00 : f32
    %46 = vector.broadcast %cst_25 : f32 to vector<8x512xf32>
    %47 = arith.maximumf %45, %46 : vector<8x512xf32>
    %48 = vector.extract_strided_slice %39 {offsets = [16, 0], sizes = [8, 512], strides = [1, 1]} : vector<48x512xf32> to vector<8x512xf32>
    %49 = arith.addf %48, %36 : vector<8x512xf32>
    %cst_26 = arith.constant 0.000000e+00 : f32
    %50 = vector.broadcast %cst_26 : f32 to vector<8x512xf32>
    %51 = arith.maximumf %49, %50 : vector<8x512xf32>
    %52 = vector.extract_strided_slice %39 {offsets = [24, 0], sizes = [8, 512], strides = [1, 1]} : vector<48x512xf32> to vector<8x512xf32>
    %53 = arith.addf %52, %36 : vector<8x512xf32>
    %cst_27 = arith.constant 0.000000e+00 : f32
    %54 = vector.broadcast %cst_27 : f32 to vector<8x512xf32>
    %55 = arith.maximumf %53, %54 : vector<8x512xf32>
    %56 = vector.extract_strided_slice %39 {offsets = [32, 0], sizes = [8, 512], strides = [1, 1]} : vector<48x512xf32> to vector<8x512xf32>
    %57 = arith.addf %56, %36 : vector<8x512xf32>
    %cst_28 = arith.constant 0.000000e+00 : f32
    %58 = vector.broadcast %cst_28 : f32 to vector<8x512xf32>
    %59 = arith.maximumf %57, %58 : vector<8x512xf32>
    %60 = vector.extract_strided_slice %39 {offsets = [40, 0], sizes = [8, 512], strides = [1, 1]} : vector<48x512xf32> to vector<8x512xf32>
    %61 = arith.addf %60, %36 : vector<8x512xf32>
    %cst_29 = arith.constant 0.000000e+00 : f32
    %62 = vector.broadcast %cst_29 : f32 to vector<8x512xf32>
    %63 = arith.maximumf %61, %62 : vector<8x512xf32>
    %64 = tpu.concatenate %43, %47, %51, %55, %59, %63 in 0 : vector<8x512xf32>, vector<8x512xf32>, vector<8x512xf32>, vector<8x512xf32>, vector<8x512xf32>, vector<8x512xf32> -> vector<48x512xf32>
    %65 = arith.truncf %64 : vector<48x512xf32> to vector<48x512xbf16>
    %c0_30 = arith.constant 0 : index
    %c0_31 = arith.constant 0 : index
    %66 = vector.load %arg8[%c0_30, %c0_31] : memref<512x128xbf16, #tpu.memory_space<vmem>>, vector<512x128xbf16>
    %cst_32 = arith.constant dense<0.000000e+00> : vector<48x128xf32>
    %67 = tpu.matmul %65, %66, %cst_32 {dimension_numbers = #tpu.dot_dimension_numbers<[1], [0], [0], [1], [0, 0, 1, 1], [], []>} : vector<48x512xbf16>, vector<512x128xbf16>, vector<48x128xf32> -> vector<48x128xf32>
    %c0_33 = arith.constant 0 : index
    %c0_34 = arith.constant 0 : index
    %68 = vector.load %arg9[%c0_33, %c0_34] : memref<1x128xf32, #tpu.memory_space<vmem>>, vector<1x128xf32>
    %69 = vector.broadcast %68 : vector<1x128xf32> to vector<48x128xf32>
    %70 = arith.addf %67, %69 : vector<48x128xf32>
    %cst_35 = arith.constant 0.000000e+00 : f32
    %71 = vector.broadcast %cst_35 : f32 to vector<48x128xf32>
    %72 = arith.maximumf %70, %71 : vector<48x128xf32>
    %73 = vector.extract_strided_slice %72 {offsets = [0, 0], sizes = [8, 128], strides = [1, 1]} : vector<48x128xf32> to vector<8x128xf32>
    %74 = vector.extract_strided_slice %72 {offsets = [8, 0], sizes = [8, 128], strides = [1, 1]} : vector<48x128xf32> to vector<8x128xf32>
    %75 = arith.addf %73, %74 : vector<8x128xf32>
    %76 = vector.extract_strided_slice %72 {offsets = [16, 0], sizes = [8, 128], strides = [1, 1]} : vector<48x128xf32> to vector<8x128xf32>
    %77 = arith.addf %75, %76 : vector<8x128xf32>
    %78 = vector.extract_strided_slice %72 {offsets = [24, 0], sizes = [8, 128], strides = [1, 1]} : vector<48x128xf32> to vector<8x128xf32>
    %79 = arith.addf %77, %78 : vector<8x128xf32>
    %80 = vector.extract_strided_slice %72 {offsets = [32, 0], sizes = [8, 128], strides = [1, 1]} : vector<48x128xf32> to vector<8x128xf32>
    %81 = arith.addf %79, %80 : vector<8x128xf32>
    %82 = vector.extract_strided_slice %72 {offsets = [40, 0], sizes = [8, 128], strides = [1, 1]} : vector<48x128xf32> to vector<8x128xf32>
    %83 = arith.addf %81, %82 : vector<8x128xf32>
    %84 = arith.truncf %83 : vector<8x128xf32> to vector<8x128xbf16>
    %c0_36 = arith.constant 0 : index
    %c0_37 = arith.constant 0 : index
    %85 = vector.load %arg10[%c0_36, %c0_37] : memref<128x512xbf16, #tpu.memory_space<vmem>>, vector<128x512xbf16>
    %cst_38 = arith.constant dense<0.000000e+00> : vector<8x512xf32>
    %86 = tpu.matmul %84, %85, %cst_38 {dimension_numbers = #tpu.dot_dimension_numbers<[1], [0], [0], [1], [0, 0, 1, 1], [], []>} : vector<8x128xbf16>, vector<128x512xbf16>, vector<8x512xf32> -> vector<8x512xf32>
    %c0_39 = arith.constant 0 : index
    %c0_40 = arith.constant 0 : index
    %87 = vector.load %arg11[%c0_39, %c0_40] : memref<1x512xf32, #tpu.memory_space<vmem>>, vector<1x512xf32>
    %88 = vector.broadcast %87 : vector<1x512xf32> to vector<8x512xf32>
    %89 = arith.addf %86, %88 : vector<8x512xf32>
    %cst_41 = arith.constant 0.000000e+00 : f32
    %90 = vector.broadcast %cst_41 : f32 to vector<8x512xf32>
    %91 = arith.maximumf %89, %90 : vector<8x512xf32>
    %92 = arith.truncf %91 : vector<8x512xf32> to vector<8x512xbf16>
    %c0_42 = arith.constant 0 : index
    %c0_43 = arith.constant 0 : index
    %93 = vector.load %arg12[%c0_42, %c0_43] : memref<2x512xbf16, #tpu.memory_space<vmem>>, vector<2x512xbf16>
    %cst_44 = arith.constant dense<0.000000e+00> : vector<8x2xf32>
    %94 = tpu.matmul %92, %93, %cst_44 {dimension_numbers = #tpu.dot_dimension_numbers<[1], [1], [0], [0], [0, 0, 1, 0], [], []>} : vector<8x512xbf16>, vector<2x512xbf16>, vector<8x2xf32> -> vector<8x2xf32>
    %c0_45 = arith.constant 0 : index
    %c0_46 = arith.constant 0 : index
    %95 = vector.load %arg13[%c0_45, %c0_46] : memref<1x2xf32, #tpu.memory_space<vmem>>, vector<1x2xf32>
    %96 = vector.broadcast %95 : vector<1x2xf32> to vector<8x2xf32>
    %97 = arith.addf %94, %96 : vector<8x2xf32>
    %c0_47 = arith.constant 0 : index
    %c0_48 = arith.constant 0 : index
    %98 = vector.load %arg14[%c0_47, %c0_48] : memref<8x2xf32, #tpu.memory_space<vmem>>, vector<8x2xf32>
    tpu.vector_store %arg14[%c0_47, %c0_48], %97 {strides = array<i32>} : memref<8x2xf32, #tpu.memory_space<vmem>>, vector<8x2xf32>,
    return
  }
}

</mosaic_0001>

<bundles_post_ra>
// kernel: _forward_impl.1
= control target key start
LH: loop header
LB: loop body
LE: loop exit
PB: predicated region body
PF: predicated region fallthrough
CT: control target
= control target key end

     0   :  { %v2347_v0 = vmov 0.0|0.0   ;;  %vm2348_vm0 = vmmov 0   ;;  %v2349_v4 = vmov 0.0   ;;  %vm58_vm1 = vcmask 261120   ;;  %s2831_s1 = inlined_call_operand.vmem [shape: f32[32,32], index: 1, kind: input, shape index: {}]   ;;  %s2832_s0 = inlined_call_operand.vmem [shape: f32[48,32], index: 0, kind: input, shape index: {}]   ;;  %s2833_s5 = inlined_call_operand.vmem [shape: bf16[14,512], index: 5, kind: input, shape index: {}]   ;;  %s2834_s2 = inlined_call_operand.vmem [shape: bf16[8,14], index: 2, kind: input, shape index: {}]   ;;  %s2835_s4 = inlined_call_operand.vmem [shape: bf16[32,512], index: 4, kind: input, shape index: {}]   ;;  %s2836_s6 = inlined_call_operand.vmem [shape: bf16[36,512], index: 6, kind: input, shape index: {}]   ;;  %s2837_s3 = inlined_call_operand.vmem [shape: bf16[48,36], index: 3, kind: input, shape index: {}]   ;;  %s2838_s8 = inlined_call_operand.vmem [shape: bf16[512,128], index: 8, kind: input, shape index: {}]   ;;  %s2839_s7 = inlined_call_operand.vmem [shape: f32[1,512], index: 7, kind: input, shape index: {}]   ;;  %s2840_s10 = inlined_call_operand.vmem [shape: bf16[128,512], index: 10, kind: input, shape index: {}]   ;;  %s2841_s9 = inlined_call_operand.vmem [shape: f32[1,128], index: 9, kind: input, shape index: {}]   ;;  %s2842_s12 = inlined_call_operand.vmem [shape: bf16[2,512], index: 12, kind: input, shape index: {}]   ;;  %s2843_s11 = inlined_call_operand.vmem [shape: f32[1,512], index: 11, kind: input, shape index: {}]   ;;  %s2844_s13 = inlined_call_operand.vmem [shape: f32[1,2], index: 13, kind: input, shape index: {}]   ;;  %s2845_s14 = inlined_call_operand.vmem [shape: f32[8,2], index: 14, kind: output, shape index: {}]  }
   0x1   :  { %2172 = vmatprep.subr.bf16.mxu1 %v2347_v0  ;;  %v54_v1 = vld [vmem:[%s2831_s1] sm:$0xff]  ;;  %v55_v2 = vld [vmem:[%s2831_s1 + $0x8] sm:$0xff]  ;;  %v56_v3 = vld [vmem:[%s2831_s1 + $0x10] sm:$0xff]  ;;  %2114 = vmatprep.mubr.msk.f32.mxu1 %vm2348_vm0, %v2349_v4  ;;  %vm543_vm2 = vcmask 1046528   ;;  %v2350_v38 = vmov 0   ;;  %vm539_vm3 = vcmask 113664  }
   0x2   :  { %v2173_v5 = vpack.c.bf16 %v55_v2, %v54_v1  ;;  %v57_v6 = vld [vmem:[%s2831_s1 + $0x18] sm:$0xff]  ;;  %2184 = vmatprep.subr.bf16.mxu0 %v2347_v0  ;;  %2136 = vmatprep.mubr.msk.f32.mxu0 %vm2348_vm0, %v2349_v4  ;;  %v48_v8 = vld [vmem:[%s2832_s0] sm:$0xff]  ;;  %v49_v13 = vld [vmem:[%s2832_s0 + $0x8] sm:$0xff]  ;;  %vm880_vm4 = vcmask 1041408   ;;  %vm870_vm5 = vcmask 293888   ;;  %vm1889_vm6 = vcmask 15360  }
   0x3   :  { %v2176_v7 = vpack.c.bf16 %v57_v6, %v56_v3  ;;  %v50_v18 = vld [vmem:[%s2832_s0 + $0x10] sm:$0xff]  ;;  %v51_v23 = vld [vmem:[%s2832_s0 + $0x18] sm:$0xff]  ;;  %v52_v28 = vld [vmem:[%s2832_s0 + $0x20] sm:$0xff] }
   0x4   :  { %2174 = vmatpush3.bf16.msra.mxu1 %v2173_v5  ;;  %2186 = vmatpush3.bf16.msra.mxu0 %v2173_v5  ;;  %v2218_v33 = vld [vmem:[%s2833_s5 + $0x4] ss:$16 sps:$4 sm:$0x7f]   ;;  %v2220_v34 = vld [vmem:[%s2833_s5] ss:$16 sps:$4 sm:$0x7f]  }
   0x5   :  { %2175 = vmatprep.subr.bf16.mxu1 %v2347_v0  ;;  %2187 = vmatprep.subr.bf16.mxu0 %v2347_v0  ;;  %v2221_v35 = vld [vmem:[%s2833_s5 + $0xc] ss:$16 sps:$4 sm:$0x7f]   ;;  %v545_v36 = vsel %vm543_vm2, %v2220_v34, 0  ;;  %v518_v40 = vld [vmem:[%s2834_s2] sm:$0xf] }
   0x6   :  { %v2223_v37 = vld [vmem:[%s2833_s5 + $0x8] ss:$16 sps:$4 sm:$0x7f]   ;;  %v2226_v41 = vld [vmem:[%s2835_s4 + $0x4] ss:$16 sps:$4 sm:$0xff]  }
   0x7   :  { %v551_v39 = vsel %vm543_vm2, %v2223_v37, 0  ;;  %v2224_v42 = vld [vmem:[%s2835_s4] ss:$16 sps:$4 sm:$0xff]   ;;  %v2227_v43 = vld [vmem:[%s2835_s4 + $0x8] ss:$16 sps:$4 sm:$0xff]  }
   0x8   :  { %2177 = vmatpush3.bf16.msra.mxu1 %v2176_v7  ;;  %2189 = vmatpush3.bf16.msra.mxu0 %v2176_v7  ;;  %v2229_v44 = vld [vmem:[%s2835_s4 + $0xc] ss:$16 sps:$4 sm:$0xff]   ;;  %v2232_v45 = vld [vmem:[%s2835_s4 + $0x24] ss:$16 sps:$4 sm:$0xff]   ;;  %v2230_v47 = vld [vmem:[%s2835_s4 + $0x20] ss:$16 sps:$4 sm:$0xff]  }
   0x9   :  { %2178 = vmatprep.subr.bf16.mxu1 %v2347_v0  ;;  %2196 = vmatprep.subr.bf16.mxu0 %v2347_v0  ;;  %v2235_v46 = vld [vmem:[%s2835_s4 + $0x2c] ss:$16 sps:$4 sm:$0xff]   ;;  %v2233_v48 = vld [vmem:[%s2835_s4 + $0x28] ss:$16 sps:$4 sm:$0xff]   ;;  %v2238_v49 = vld [vmem:[%s2836_s6 + $0x4] ss:$16 sps:$4 sm:$0xff]  }
   0xa   :  { %v2241_v50 = vld [vmem:[%s2836_s6 + $0xc] ss:$16 sps:$4 sm:$0xff]   ;;  %v2236_v56 = vld [vmem:[%s2836_s6] ss:$16 sps:$4 sm:$0xff]   ;;  %v2239_v57 = vld [vmem:[%s2836_s6 + $0x8] ss:$16 sps:$4 sm:$0xff]  }
   0xb   :  { %2115 = vmatmul.mubr.f32.vlgmr.msra.gmra.mrb[0].mxu1 %v2349_v4  ;;  %v53_v51 = vld [vmem:[%s2832_s0 + $0x28] sm:$0xff]  ;;  %v2244_v59 = vld [vmem:[%s2836_s6 + $0x24] ss:$16 sps:$4 sm:$0xff]   ;;  %v2242_v63 = vld [vmem:[%s2836_s6 + $0x20] ss:$16 sps:$4 sm:$0xff]  }
   0xc   :  { %2180 = vmatpush3.bf16.msra.mxu1 %v2173_v5  ;;  %2125 = vmatprep.mubr.msk.f32.mxu1 %vm2348_vm0, %v2349_v4  ;;  %v2247_v60 = vld [vmem:[%s2836_s6 + $0x2c] ss:$16 sps:$4 sm:$0xff]   ;;  %v803_v61 = vld [vmem:[%s2836_s6 + $0x40] sm:$0x33] }
   0xd   :  { %2181 = vmatprep.subr.bf16.mxu1 %v2347_v0  ;;  %v804_v62 = vld [vmem:[%s2836_s6 + $0x48] sm:$0x33]  ;;  %v1930_v1 = vcombine.high %v803_v61, %v803_v61  ;;  %v1929_v3 = vcombine.low %v803_v61, %v803_v61  ;;  %v2271_v34 = vld [vmem:[%s2838_s8 + $0x60] sm:$0xff]  }
   0xe   :  { %v1932_v2 = vcombine.high %v804_v62, %v804_v62  ;;  %v2274_v37 = vld [vmem:[%s2838_s8 + $0xa0] sm:$0xff]  }
  0x10   :  { %2183 = vmatpush3.bf16.msra.mxu1 %v2176_v7 }
  0x11   :  { %2190 = vmatprep.subr.bf16.mxu1 %v2347_v0 }
  0xde   :  { %v128_v9 = vpop.f32.mrb[0].mxu1 }
  0xdf   :  { %v132_v10 = vadd.f32 %v128_v9, %v48_v8  ;;  %v2116_v11 = vpop.f32.mrb[1].mxu1  ;;  %v2256_v8 = vld [vmem:[%s2838_s8 + $0xc0] sm:$0xff]  }
  0xe0   :  { %v2252_v9 = vld [vmem:[%s2837_s3] sm:$0xff]  }
  0xe1   :  { %2335 = vtanh.f32 %v132_v10  ;;  %v2257_v10 = vld [vmem:[%s2838_s8] sm:$0xff]  }
  0xe2   :  { %v2258_v11 = vld [vmem:[%s2838_s8 + $0x80] sm:$0xff]  }
  0xeb   :  { %v2336_v12 = vpop.eup %2335 }
  0xec   :  { %2126 = vmatmul.mubr.msk.f32.vlgmr.msra.gmra.mrb[2].mxu1 %vm58_vm1, %v2336_v12  ;;  %v2259_v12 = vld [vmem:[%s2838_s8 + $0x48] sm:$0xff]  }
  0xed   :  { %2192 = vmatpush3.bf16.msra.mxu1 %v2173_v5  ;;  %2147 = vmatprep.mubr.msk.f32.mxu1 %vm2348_vm0, %v2349_v4 }
  0xee   :  { %2193 = vmatprep.subr.bf16.mxu1 %v2347_v0 }
  0xf1   :  { %2195 = vmatpush3.bf16.msra.mxu1 %v2176_v7 }
  0xf2   :  { %2202 = vmatprep.subr.bf16.mxu1 %v2347_v0 }
 0x1bf   :  { %v203_v14 = vpop.f32.mrb[2].mxu1 }
 0x1c0   :  { %v207_v15 = vadd.f32 %v203_v14, %v49_v13  ;;  %v2127_v16 = vpop.f32.mrb[3].mxu1  ;;  %v2260_v13 = vld [vmem:[%s2838_s8 + $0xc8] sm:$0xff]  }
 0x1c1   :  { %v2261_v14 = vld [vmem:[%s2838_s8 + $0x8] sm:$0xff]   ;;  %v2263_v16 = vld [vmem:[%s2838_s8 + $0x50] sm:$0xff]  }
 0x1c2   :  { %2337 = vtanh.f32 %v207_v15  ;;  %v2262_v15 = vld [vmem:[%s2838_s8 + $0x88] sm:$0xff]  }
 0x1cc   :  { %v2338_v17 = vpop.eup %2337 }
 0x1cd   :  { %2137 = vmatmul.mubr.msk.f32.vlgmr.msra.gmra.mrb[0].mxu0 %vm58_vm1, %v2338_v17  ;;  %v2264_v17 = vld [vmem:[%s2838_s8 + $0xd0] sm:$0xff]  }
 0x1ce   :  { %2198 = vmatpush3.bf16.msra.mxu0 %v2173_v5  ;;  %2158 = vmatprep.mubr.msk.f32.mxu0 %vm2348_vm0, %v2349_v4 }
 0x1cf   :  { %2199 = vmatprep.subr.bf16.mxu0 %v2347_v0 }
 0x1d2   :  { %2201 = vmatpush3.bf16.msra.mxu0 %v2176_v7 }
 0x1d3   :  { %1904 = vmatprep.subr.msk.bf16.mxu0 %vm543_vm2, %v2218_v33  ;;  %v2270_v33 = vld [vmem:[%s2838_s8 + $0x98] sm:$0xff]  }
 0x2a0   :  { %v278_v19 = vpop.f32.mrb[0].mxu0 }
 0x2a1   :  { %v282_v20 = vadd.f32 %v278_v19, %v50_v18  ;;  %v2138_v21 = vpop.f32.mrb[1].mxu0  ;;  %v2253_v18 = vld [vmem:[%s2837_s3 + $0x8] sm:$0xff]   ;;  %v2265_v19 = vld [vmem:[%s2838_s8 + $0x10] sm:$0xff]  }
 0x2a2   :  { %v2254_v21 = vld [vmem:[%s2837_s3 + $0x10] sm:$0xff]  }
 0x2a3   :  { %2339 = vtanh.f32 %v282_v20  ;;  %v2266_v20 = vld [vmem:[%s2838_s8 + $0x90] sm:$0xff]  }
 0x2ad   :  { %v2340_v22 = vpop.eup %2339 }
 0x2ae   :  { %2148 = vmatmul.mubr.msk.f32.vlgmr.msra.gmra.mrb[4].mxu1 %vm58_vm1, %v2340_v22 }
 0x2af   :  { %2204 = vmatpush3.bf16.msra.mxu1 %v2173_v5  ;;  %2169 = vmatprep.mubr.msk.f32.mxu1 %vm2348_vm0, %v2349_v4  ;;  %v1931_v4 = vcombine.low %v804_v62, %v804_v62  ;;  %v882_v5 = vsel %vm880_vm4, %v1929_v3, 0  ;;  %v763_v3 = vld [vmem:[%s2839_s7] sm:$0xf] }
 0x2b0   :  { %2205 = vmatprep.subr.bf16.mxu1 %v2347_v0  ;;  %v2245_v0 = vld [vmem:[%s2836_s6 + $0x28] ss:$16 sps:$4 sm:$0xff]  }
 0x2b1   :  { %v888_v6 = vsel %vm880_vm4, %v1931_v4, 0 }
 0x2b3   :  { %2207 = vmatpush3.bf16.msra.mxu1 %v2176_v7  ;;  %v2255_v7 = vld [vmem:[%s2838_s8 + $0x40] sm:$0xff]  }
 0x2b4   :  { %1906 = vmatprep.subr.msk.bf16.mxu1 %vm543_vm2, %v2221_v35  ;;  %v2272_v35 = vld [vmem:[%s2838_s8 + $0xe0] sm:$0xff]  }
 0x381   :  { %v353_v24 = vpop.f32.mrb[4].mxu1 }
 0x382   :  { %v357_v25 = vadd.f32 %v353_v24, %v51_v23  ;;  %v2149_v26 = vpop.f32.mrb[5].mxu1 }
 0x384   :  { %2341 = vtanh.f32 %v357_v25 }
 0x38e   :  { %v2342_v27 = vpop.eup %2341 }
 0x38f   :  { %2159 = vmatmul.mubr.msk.f32.vlgmr.msra.gmra.mrb[2].mxu0 %vm58_vm1, %v2342_v27 }
 0x390   :  { %557 = vmatpush1.bf16.msra.mxu0 %v545_v36  ;;  %588 = vmatprep.mubr.bf16.mxu0 %v2350_v38  ;;  %v2273_v36 = vld [vmem:[%s2838_s8 + $0x20] sm:$0xff]  }
 0x391   :  { %681 = vmatprep.subr.bf16.mxu0 %v2226_v41  ;;  %v2277_v41 = vld [vmem:[%s2838_s8 + $0x28] sm:$0xff]  }
 0x393   :  { %1905 = vmatmul.mubr.msk.bf16.vlgmr.msra.gmra.mrb[4].mxu0 %vm539_vm3, %v518_v40 }
 0x394   :  { %713 = vmatprep.mubr.bf16.mxu0 %v2350_v38  ;;  %682 = vmatpush1.bf16.msra.mxu0 %v2224_v42  ;;  %v2278_v42 = vld [vmem:[%s2838_s8 + $0xa8] sm:$0xff]  }
 0x395   :  { %683 = vmatprep.subr.bf16.mxu0 %v2232_v45  ;;  %v2281_v45 = vld [vmem:[%s2838_s8 + $0x30] sm:$0xff]  }
 0x398   :  { %684 = vmatpush1.bf16.msra.mxu0 %v2230_v47  ;;  %v2283_v47 = vld [vmem:[%s2838_s8 + $0x78] sm:$0xff]  }
 0x399   :  { %893 = vmatprep.subr.bf16.mxu0 %v2238_v49  ;;  %v2285_v49 = vld [vmem:[%s2838_s8 + $0x38] sm:$0xff]  }
 0x462   :  { %v428_v29 = vpop.f32.mrb[2].mxu0 }
 0x463   :  { %v432_v30 = vadd.f32 %v428_v29, %v52_v28  ;;  %v2160_v31 = vpop.f32.mrb[3].mxu0 }
 0x464   :  { %v2268_v31 = vld [vmem:[%s2838_s8 + $0xd8] sm:$0xff]  }
 0x465   :  { %2343 = vtanh.f32 %v432_v30  ;;  %v2267_v30 = vld [vmem:[%s2838_s8 + $0x58] sm:$0xff]  }
 0x466   :  { %v590_v22 = vpop.f32.mrb[4].mxu0 }
 0x467   :  { %v592_v23 = vpop.f32.mrb[5].mxu0 }
 0x468   :  { %v594_v24 = vpop.f32.mrb[6].mxu0 }
 0x469   :  { %v595_v26 = vpop.f32.mrb[7].mxu0 }
 0x46f   :  { %v2344_v32 = vpop.eup %2343 }
 0x470   :  { %2170 = vmatmul.mubr.msk.f32.vlgmr.msra.gmra.mrb[6].mxu1 %vm58_vm1, %v2344_v32  ;;  %v2269_v32 = vld [vmem:[%s2838_s8 + $0x18] sm:$0xff]  }
 0x471   :  { %629 = vmatprep.mubr.bf16.mxu1 %v2350_v38  ;;  %598 = vmatpush1.bf16.msra.mxu1 %v551_v39  ;;  %v2275_v39 = vld [vmem:[%s2838_s8 + $0x68] sm:$0xff]  }
 0x472   :  { %722 = vmatprep.subr.bf16.mxu1 %v2229_v44  ;;  %v2280_v44 = vld [vmem:[%s2838_s8 + $0xf0] sm:$0xff]  }
 0x474   :  { %1907 = vmatmul.mubr.msk.bf16.vlgmr.msra.gmra.mrb[8].mxu1 %vm539_vm3, %v518_v40  ;;  %v2276_v40 = vld [vmem:[%s2838_s8 + $0xe8] sm:$0xff]  }
 0x475   :  { %754 = vmatprep.mubr.bf16.mxu1 %v2350_v38  ;;  %723 = vmatpush1.bf16.msra.mxu1 %v2227_v43  ;;  %v2279_v43 = vld [vmem:[%s2838_s8 + $0x70] sm:$0xff]  }
 0x476   :  { %724 = vmatprep.subr.bf16.mxu1 %v2235_v46  ;;  %v2282_v46 = vld [vmem:[%s2838_s8 + $0xb0] sm:$0xff]  }
 0x479   :  { %725 = vmatpush1.bf16.msra.mxu1 %v2233_v48  ;;  %v2284_v48 = vld [vmem:[%s2838_s8 + $0xf8] sm:$0xff]  }
 0x47a   :  { %956 = vmatprep.subr.bf16.mxu1 %v2241_v50  ;;  %v2286_v50 = vld [vmem:[%s2838_s8 + $0xb8] sm:$0xff]  }
 0x543   :  { %v503_v52 = vpop.f32.mrb[6].mxu1 }
 0x544   :  { %v507_v53 = vadd.f32 %v503_v52, %v53_v51  ;;  %v2171_v54 = vpop.f32.mrb[7].mxu1  ;;  %v765_v51 = vlaneseq }
 0x546   :  { %2345 = vtanh.f32 %v507_v53  ;;  %v2660_v52 = vshrl.u32 %v765_v51, 7 }
 0x547   :  { %v631_v25 = vpop.f32.mrb[8].mxu1 }
 0x548   :  { %v633_v27 = vpop.f32.mrb[9].mxu1  ;;  %v771_v4 = vsub.s32 1, %v2660_v52 }
 0x549   :  { %v635_v28 = vpop.f32.mrb[10].mxu1 }
 0x54a   :  { %v636_v29 = vpop.f32.mrb[11].mxu1 }
 0x550   :  { %v2346_v55 = vpop.eup %2345 }
 0x551   :  { %v509_v58 = vpack.c.bf16 %v2346_v55, %v2346_v55 }
 0x553   :  { %1916 = vmatmul.mubr.msk.bf16.vlgmr.msra.gmra.mrb[8].mxu0 %vm58_vm1, %v509_v58  ;;  %1917 = vmatmul.mubr.msk.bf16.vlgmr.msra.gmra.mrb[12].mxu1 %vm58_vm1, %v509_v58 }
 0x554   :  { %894 = vmatpush1.bf16.msra.mxu0 %v2236_v56  ;;  %957 = vmatpush1.bf16.msra.mxu1 %v2239_v57 }
 0x555   :  { %895 = vmatprep.subr.bf16.mxu0 %v2244_v59  ;;  %958 = vmatprep.subr.bf16.mxu1 %v2247_v60 }
 0x556   :  { %925 = vmatprep.mubr.bf16.mxu0 %v2350_v38  ;;  %988 = vmatprep.mubr.bf16.mxu1 %v2350_v38 }
 0x558   :  { %896 = vmatpush1.bf16.msra.mxu0 %v2242_v63  ;;  %959 = vmatpush1.bf16.msra.mxu1 %v2245_v0  ;;  %v767_v63 = vsub.s32 0, %v2660_v52  ;;  %v775_v0 = vsub.s32 2, %v2660_v52 }
 0x559   :  { %1933 = vmatprep.subr.msk.bf16.mxu0 %vm880_vm4, %v1930_v1  ;;  %1937 = vmatprep.subr.msk.bf16.mxu1 %vm880_vm4, %v1932_v2 }
 0x55c   :  { %898 = vmatpush1.bf16.msra.mxu0 %v882_v5  ;;  %961 = vmatpush1.bf16.msra.mxu1 %v888_v6  ;;  %v779_v5 = vsub.s32 3, %v2660_v52  ;;  %v768_v6 = vrot.slane %v763_v3, %v767_v63 }
 0x55d   :  { %2038 = vmatprep.subr.bf16.mxu0 %v2255_v7  ;;  %2072 = vmatprep.subr.bf16.mxu1 %v2256_v8  ;;  %v776_v7 = vrot.slane %v763_v3, %v775_v0  ;;  %v772_v8 = vrot.slane %v763_v3, %v771_v4 }
 0x55f   :  { %1934 = vmatmul.mubr.msk.bf16.vlgmr.msra.gmra.mrb[12].mxu0 %vm870_vm5, %v2252_v9  ;;  %1938 = vmatmul.mubr.msk.bf16.vlgmr.msra.gmra.mrb[16].mxu1 %vm870_vm5, %v2252_v9  ;;  %v780_v9 = vrot.slane %v763_v3, %v779_v5 }
 0x560   :  { %935 = vmatprep.mubr.bf16.mxu0 %v2350_v38  ;;  %998 = vmatprep.mubr.bf16.mxu1 %v2350_v38 }
 0x561   :  { %2039 = vmatpush3.bf16.msra.mxu0 %v2257_v10  ;;  %2073 = vmatpush3.bf16.msra.mxu1 %v2258_v11 }
 0x562   :  { %2040 = vmatprep.subr.bf16.mxu0 %v2259_v12  ;;  %2074 = vmatprep.subr.bf16.mxu1 %v2260_v13 }
 0x565   :  { %2041 = vmatpush3.bf16.msra.mxu0 %v2261_v14  ;;  %2075 = vmatpush3.bf16.msra.mxu1 %v2262_v15 }
 0x566   :  { %2042 = vmatprep.subr.bf16.mxu0 %v2263_v16  ;;  %2076 = vmatprep.subr.bf16.mxu1 %v2264_v17 }
 0x567   :  { %1935 = vmatmul.mubr.msk.bf16.gmra.mrb[16].mxu0 %vm870_vm5, %v2253_v18  ;;  %1939 = vmatmul.mubr.msk.bf16.gmra.mrb[20].mxu1 %vm870_vm5, %v2253_v18 }
 0x568   :  { %945 = vmatprep.mubr.bf16.mxu0 %v2350_v38  ;;  %1008 = vmatprep.mubr.bf16.mxu1 %v2350_v38 }
 0x569   :  { %2043 = vmatpush3.bf16.msra.mxu0 %v2265_v19  ;;  %2077 = vmatpush3.bf16.msra.mxu1 %v2266_v20 }
 0x56a   :  { %2044 = vmatprep.subr.bf16.mxu0 %v2267_v30  ;;  %2078 = vmatprep.subr.bf16.mxu1 %v2268_v31 }
 0x56d   :  { %2045 = vmatpush3.bf16.msra.mxu0 %v2269_v32  ;;  %2079 = vmatpush3.bf16.msra.mxu1 %v2270_v33 }
 0x56e   :  { %2046 = vmatprep.subr.bf16.mxu0 %v2271_v34  ;;  %2080 = vmatprep.subr.bf16.mxu1 %v2272_v35 }
 0x56f   :  { %1936 = vmatmul.mubr.msk.bf16.gmra.mrb[20].mxu0 %vm870_vm5, %v2254_v21  ;;  %1940 = vmatmul.mubr.msk.bf16.gmra.mrb[24].mxu1 %vm870_vm5, %v2254_v21 }
 0x571   :  { %2047 = vmatpush3.bf16.msra.mxu0 %v2273_v36  ;;  %2081 = vmatpush3.bf16.msra.mxu1 %v2274_v37 }
 0x572   :  { %2048 = vmatprep.subr.bf16.mxu0 %v2275_v39  ;;  %2082 = vmatprep.subr.bf16.mxu1 %v2276_v40 }
 0x575   :  { %2049 = vmatpush3.bf16.msra.mxu0 %v2277_v41  ;;  %2083 = vmatpush3.bf16.msra.mxu1 %v2278_v42 }
 0x576   :  { %2050 = vmatprep.subr.bf16.mxu0 %v2279_v43  ;;  %2084 = vmatprep.subr.bf16.mxu1 %v2280_v44 }
 0x579   :  { %2051 = vmatpush3.bf16.msra.mxu0 %v2281_v45  ;;  %2085 = vmatpush3.bf16.msra.mxu1 %v2282_v46 }
 0x57a   :  { %2052 = vmatprep.subr.bf16.mxu0 %v2283_v47  ;;  %2086 = vmatprep.subr.bf16.mxu1 %v2284_v48 }
 0x57d   :  { %2053 = vmatpush3.bf16.msra.mxu0 %v2285_v49  ;;  %2087 = vmatpush3.bf16.msra.mxu1 %v2286_v50 }
 0x626   :  { %v715_v53 = vpop.f32.mrb[8].mxu0  ;;  %v756_v54 = vpop.f32.mrb[12].mxu1 }
 0x627   :  { %v716_v55 = vadd.f32 %v715_v53, %v590_v22  ;;  %v757_v56 = vadd.f32 %v756_v54, %v631_v25  ;;  %v717_v57 = vpop.f32.mrb[9].mxu0  ;;  %v758_v58 = vpop.f32.mrb[13].mxu1 }
 0x628   :  { %v718_v59 = vadd.f32 %v717_v57, %v592_v23  ;;  %v759_v60 = vadd.f32 %v758_v58, %v633_v27  ;;  %v719_v61 = vpop.f32.mrb[10].mxu0  ;;  %v760_v62 = vpop.f32.mrb[14].mxu1 }
 0x629   :  { %v720_v1 = vpop.f32.mrb[11].mxu0  ;;  %v761_v2 = vpop.f32.mrb[15].mxu1  ;;  %v2677_v10 = vadd.f32 %v768_v6, %v716_v55  ;;  %v2679_v11 = vadd.f32 %v776_v7, %v757_v56 }
 0x62a   :  { %v2681_v12 = vadd.f32 %v772_v8, %v718_v59  ;;  %v2683_v13 = vadd.f32 %v780_v9, %v759_v60 }
 0x632   :  { %v927_v14 = vpop.f32.mrb[12].mxu0  ;;  %v990_v15 = vpop.f32.mrb[16].mxu1 }
 0x633   :  { %v1019_v16 = vadd.f32 %v927_v14, %v2677_v10  ;;  %v1021_v17 = vadd.f32 %v990_v15, %v2679_v11  ;;  %v929_v18 = vpop.f32.mrb[13].mxu0  ;;  %v992_v19 = vpop.f32.mrb[17].mxu1 }
 0x634   :  { %v1020_v20 = vadd.f32 %v929_v18, %v2681_v12  ;;  %v1022_v21 = vadd.f32 %v992_v19, %v2683_v13  ;;  %v931_v22 = vpop.f32.mrb[14].mxu0  ;;  %v994_v23 = vpop.f32.mrb[18].mxu1 }
 0x635   :  { %v1027_v24 = vadd.f32 %v931_v22, %v2677_v10  ;;  %v1029_v25 = vadd.f32 %v994_v23, %v2679_v11  ;;  %v933_v26 = vpop.f32.mrb[15].mxu0  ;;  %v996_v27 = vpop.f32.mrb[19].mxu1  ;;  %v1023_v30 = vmax.f32 %v1019_v16, 0.0  ;;  %v1025_v31 = vmax.f32 %v1021_v17, 0.0 }
 0x636   :  { %v1028_v28 = vadd.f32 %v933_v26, %v2681_v12  ;;  %v1030_v29 = vadd.f32 %v996_v27, %v2683_v13  ;;  %v1024_v34 = vmax.f32 %v1020_v20, 0.0  ;;  %v1026_v35 = vmax.f32 %v1022_v21, 0.0 }
 0x637   :  { %v1031_v32 = vmax.f32 %v1027_v24, 0.0  ;;  %v1033_v33 = vmax.f32 %v1029_v25, 0.0 }
 0x638   :  { %v1032_v36 = vmax.f32 %v1028_v28, 0.0  ;;  %v1034_v37 = vmax.f32 %v1030_v29, 0.0 }
 0x639   :  { %v1067_v39 = vpack.c.bf16 %v1031_v32, %v1023_v30  ;;  %v1069_v40 = vpack.c.bf16 %v1033_v33, %v1025_v31 }
 0x63a   :  { %v1068_v41 = vpack.c.bf16 %v1032_v36, %v1024_v34  ;;  %v1070_v42 = vpack.c.bf16 %v1034_v37, %v1026_v35  ;;  %v937_v43 = vpop.f32.mrb[16].mxu0  ;;  %v1000_v44 = vpop.f32.mrb[20].mxu1 }
 0x63b   :  { %v1035_v45 = vadd.f32 %v937_v43, %v2677_v10  ;;  %v1037_v46 = vadd.f32 %v1000_v44, %v2679_v11  ;;  %v939_v47 = vpop.f32.mrb[17].mxu0  ;;  %v1002_v48 = vpop.f32.mrb[21].mxu1  ;;  %v2290_v43 = vld [vmem:[%s2840_s10 + $0x8] ss:$16 sps:$4 sm:$0xff]   ;;  %v2292_v44 = vld [vmem:[%s2840_s10 + $0xc] ss:$16 sps:$4 sm:$0xff]  }
 0x63c   :  { %v1036_v49 = vadd.f32 %v939_v47, %v2681_v12  ;;  %v1038_v50 = vadd.f32 %v1002_v48, %v2683_v13  ;;  %v941_v51 = vpop.f32.mrb[18].mxu0  ;;  %v1004_v53 = vpop.f32.mrb[22].mxu1  ;;  %1374 = vmatprep.mubr.bf16.mxu0 %v1068_v41  ;;  %1431 = vmatprep.mubr.bf16.mxu1 %v1070_v42  ;;  %v2296_v47 = vld [vmem:[%s2840_s10 + $0x28] ss:$16 sps:$4 sm:$0xff]   ;;  %v2301_v48 = vld [vmem:[%s2840_s10 + $0x44] ss:$16 sps:$4 sm:$0xff]  }
 0x63d   :  { %v1043_v54 = vadd.f32 %v941_v51, %v2677_v10  ;;  %v1045_v55 = vadd.f32 %v1004_v53, %v2679_v11  ;;  %v943_v56 = vpop.f32.mrb[19].mxu0  ;;  %v1006_v57 = vpop.f32.mrb[23].mxu1  ;;  %1375 = vmatmul.mubr.bf16.vlgmr.msra.gmra.mrb[24].mxu0 %v1067_v39  ;;  %1432 = vmatmul.mubr.bf16.vlgmr.msra.gmra.mrb[28].mxu1 %v1069_v40  ;;  %v1039_v60 = vmax.f32 %v1035_v45, 0.0  ;;  %v1041_v61 = vmax.f32 %v1037_v46, 0.0  ;;  %v2298_v45 = vld [vmem:[%s2840_s10 + $0x2c] ss:$16 sps:$4 sm:$0xff]  }
 0x63e   :  { %v1044_v58 = vadd.f32 %v943_v56, %v2681_v12  ;;  %v1046_v59 = vadd.f32 %v1006_v57, %v2683_v13  ;;  %v1040_v2 = vmax.f32 %v1036_v49, 0.0  ;;  %v1042_v3 = vmax.f32 %v1038_v50, 0.0  ;;  %1723 = vmatprep.subr.bf16.mxu1 %v2292_v44  ;;  %v2293_v46 = vld [vmem:[%s2840_s10 + $0x20] ss:$16 sps:$4 sm:$0xff]   ;;  %v2304_v49 = vld [vmem:[%s2840_s10 + $0x4c] ss:$16 sps:$4 sm:$0xff]  }
 0x63f   :  { %v1047_v62 = vmax.f32 %v1043_v54, 0.0  ;;  %v1049_v1 = vmax.f32 %v1045_v55, 0.0  ;;  %1724 = vmatpush1.bf16.msra.mxu1 %v2290_v43  ;;  %v2299_v50 = vld [vmem:[%s2840_s10 + $0x40] ss:$16 sps:$4 sm:$0xff]   ;;  %v2302_v51 = vld [vmem:[%s2840_s10 + $0x48] ss:$16 sps:$4 sm:$0xff]  }
 0x640   :  { %v1048_v6 = vmax.f32 %v1044_v58, 0.0  ;;  %v1050_v7 = vmax.f32 %v1046_v59, 0.0  ;;  %1725 = vmatprep.subr.bf16.mxu1 %v2298_v45  ;;  %v2307_v53 = vld [vmem:[%s2840_s10 + $0x64] ss:$16 sps:$4 sm:$0xff]   ;;  %v2310_v54 = vld [vmem:[%s2840_s10 + $0x6c] ss:$16 sps:$4 sm:$0xff]  }
 0x641   :  { %v1071_v8 = vpack.c.bf16 %v1047_v62, %v1039_v60  ;;  %v1073_v9 = vpack.c.bf16 %v1049_v1, %v1041_v61  ;;  %v2305_v55 = vld [vmem:[%s2840_s10 + $0x60] ss:$16 sps:$4 sm:$0xff]   ;;  %v2308_v56 = vld [vmem:[%s2840_s10 + $0x68] ss:$16 sps:$4 sm:$0xff]   ;;  %v2313_v57 = vld [vmem:[%s2840_s10 + $0x84] ss:$16 sps:$4 sm:$0xff]  }
 0x642   :  { %v1072_v14 = vpack.c.bf16 %v1048_v6, %v1040_v2  ;;  %v1074_v15 = vpack.c.bf16 %v1050_v7, %v1042_v3  ;;  %v947_v16 = vpop.f32.mrb[20].mxu0  ;;  %v1010_v17 = vpop.f32.mrb[24].mxu1  ;;  %v2316_v58 = vld [vmem:[%s2840_s10 + $0x8c] ss:$16 sps:$4 sm:$0xff]   ;;  %v2311_v59 = vld [vmem:[%s2840_s10 + $0x80] ss:$16 sps:$4 sm:$0xff]  }
 0x643   :  { %v1051_v18 = vadd.f32 %v947_v16, %v2677_v10  ;;  %v1053_v19 = vadd.f32 %v1010_v17, %v2679_v11  ;;  %v949_v20 = vpop.f32.mrb[21].mxu0  ;;  %v1012_v21 = vpop.f32.mrb[25].mxu1  ;;  %1726 = vmatpush1.bf16.msra.mxu1 %v2296_v47  ;;  %v2314_v60 = vld [vmem:[%s2840_s10 + $0x88] ss:$16 sps:$4 sm:$0xff]   ;;  %v2319_v61 = vld [vmem:[%s2840_s10 + $0xa4] ss:$16 sps:$4 sm:$0xff]  }
 0x644   :  { %v1052_v22 = vadd.f32 %v949_v20, %v2681_v12  ;;  %v1054_v23 = vadd.f32 %v1012_v21, %v2683_v13  ;;  %v951_v24 = vpop.f32.mrb[22].mxu0  ;;  %v1014_v25 = vpop.f32.mrb[26].mxu1  ;;  %1382 = vmatprep.mubr.bf16.mxu0 %v1072_v14  ;;  %1439 = vmatprep.mubr.bf16.mxu1 %v1074_v15  ;;  %v2322_v62 = vld [vmem:[%s2840_s10 + $0xac] ss:$16 sps:$4 sm:$0xff]   ;;  %v2317_v1 = vld [vmem:[%s2840_s10 + $0xa0] ss:$16 sps:$4 sm:$0xff]  }
 0x645   :  { %v1059_v26 = vadd.f32 %v951_v24, %v2677_v10  ;;  %v1061_v27 = vadd.f32 %v1014_v25, %v2679_v11  ;;  %v953_v28 = vpop.f32.mrb[23].mxu0  ;;  %v1016_v29 = vpop.f32.mrb[27].mxu1  ;;  %1383 = vmatmul.mubr.bf16.gmra.mrb[28].mxu0 %v1071_v8  ;;  %1440 = vmatmul.mubr.bf16.gmra.mrb[32].mxu1 %v1073_v9  ;;  %v1055_v32 = vmax.f32 %v1051_v18, 0.0  ;;  %v1057_v33 = vmax.f32 %v1053_v19, 0.0  ;;  %v2320_v2 = vld [vmem:[%s2840_s10 + $0xa8] ss:$16 sps:$4 sm:$0xff]  }
 0x646   :  { %v1060_v30 = vadd.f32 %v953_v28, %v2681_v12  ;;  %v1062_v31 = vadd.f32 %v1016_v29, %v2683_v13  ;;  %v1056_v36 = vmax.f32 %v1052_v22, 0.0  ;;  %v1058_v37 = vmax.f32 %v1054_v23, 0.0  ;;  %v2289_v12 = vld [vmem:[%s2840_s10 + $0x4] ss:$16 sps:$4 sm:$0xff]   ;;  %v2287_v13 = vld [vmem:[%s2840_s10] ss:$16 sps:$4 sm:$0xff]   ;;  %1727 = vmatprep.subr.bf16.mxu1 %v2304_v49 }
 0x647   :  { %v1063_v34 = vmax.f32 %v1059_v26, 0.0  ;;  %v1065_v35 = vmax.f32 %v1061_v27, 0.0  ;;  %1682 = vmatprep.subr.bf16.mxu0 %v2289_v12  ;;  %1728 = vmatpush1.bf16.msra.mxu1 %v2302_v51  ;;  %v2325_v3 = vld [vmem:[%s2840_s10 + $0xc4] ss:$16 sps:$4 sm:$0xff]   ;;  %v2328_v6 = vld [vmem:[%s2840_s10 + $0xcc] ss:$16 sps:$4 sm:$0xff]  }
 0x648   :  { %v1064_v39 = vmax.f32 %v1060_v30, 0.0  ;;  %v1066_v40 = vmax.f32 %v1062_v31, 0.0  ;;  %1683 = vmatpush1.bf16.msra.mxu0 %v2287_v13  ;;  %1729 = vmatprep.subr.bf16.mxu1 %v2310_v54  ;;  %v2323_v7 = vld [vmem:[%s2840_s10 + $0xc0] ss:$16 sps:$4 sm:$0xff]   ;;  %v2326_v8 = vld [vmem:[%s2840_s10 + $0xc8] ss:$16 sps:$4 sm:$0xff]  }
 0x649   :  { %v1075_v41 = vpack.c.bf16 %v1063_v34, %v1055_v32  ;;  %v1077_v10 = vpack.c.bf16 %v1065_v35, %v1057_v33  ;;  %v2331_v9 = vld [vmem:[%s2840_s10 + $0xe4] ss:$16 sps:$4 sm:$0xff]   ;;  %v2334_v14 = vld [vmem:[%s2840_s10 + $0xec] ss:$16 sps:$4 sm:$0xff]   ;;  %v2329_v15 = vld [vmem:[%s2840_s10 + $0xe0] ss:$16 sps:$4 sm:$0xff]  }
 0x64a   :  { %v1076_v42 = vpack.c.bf16 %v1064_v39, %v1056_v36  ;;  %v1078_v11 = vpack.c.bf16 %v1066_v40, %v1058_v37  ;;  %v2332_v16 = vld [vmem:[%s2840_s10 + $0xe8] ss:$16 sps:$4 sm:$0xff]   ;;  %v1941_v19 = vld [vmem:[%s2841_s9] ss:$0 sm:$0xff] }
 0x64b   :  { %1730 = vmatpush1.bf16.msra.mxu1 %v2308_v56 }
 0x64c   :  { %1390 = vmatprep.mubr.bf16.mxu0 %v1076_v42  ;;  %1447 = vmatprep.mubr.bf16.mxu1 %v1078_v11 }
 0x64d   :  { %1391 = vmatmul.mubr.bf16.gmra.mrb[32].mxu0 %v1075_v41  ;;  %1448 = vmatmul.mubr.bf16.gmra.mrb[36].mxu1 %v1077_v10 }
 0x64e   :  { %1714 = vmatprep.mubr.bf16.mxu0 %v2350_v38  ;;  %1755 = vmatprep.mubr.bf16.mxu1 %v2350_v38  ;;  %v2295_v38 = vld [vmem:[%s2840_s10 + $0x24] ss:$16 sps:$4 sm:$0xff]  }
 0x64f   :  { %1684 = vmatprep.subr.bf16.mxu0 %v2295_v38  ;;  %1731 = vmatprep.subr.bf16.mxu1 %v2316_v58 }
 0x650   :  { %1685 = vmatpush1.bf16.msra.mxu0 %v2293_v46  ;;  %1732 = vmatpush1.bf16.msra.mxu1 %v2314_v60 }
 0x651   :  { %1686 = vmatprep.subr.bf16.mxu0 %v2301_v48  ;;  %1733 = vmatprep.subr.bf16.mxu1 %v2322_v62 }
 0x654   :  { %1687 = vmatpush1.bf16.msra.mxu0 %v2299_v50  ;;  %1734 = vmatpush1.bf16.msra.mxu1 %v2320_v2 }
 0x655   :  { %1688 = vmatprep.subr.bf16.mxu0 %v2307_v53  ;;  %1735 = vmatprep.subr.bf16.mxu1 %v2328_v6 }
 0x658   :  { %1689 = vmatpush1.bf16.msra.mxu0 %v2305_v55  ;;  %1736 = vmatpush1.bf16.msra.mxu1 %v2326_v8 }
 0x659   :  { %1690 = vmatprep.subr.bf16.mxu0 %v2313_v57  ;;  %1737 = vmatprep.subr.bf16.mxu1 %v2334_v14 }
 0x65c   :  { %1691 = vmatpush1.bf16.msra.mxu0 %v2311_v59  ;;  %1738 = vmatpush1.bf16.msra.mxu1 %v2332_v16 }
 0x65d   :  { %1692 = vmatprep.subr.bf16.mxu0 %v2319_v61 }
 0x660   :  { %1693 = vmatpush1.bf16.msra.mxu0 %v2317_v1 }
 0x661   :  { %1694 = vmatprep.subr.bf16.mxu0 %v2325_v3 }
 0x664   :  { %1695 = vmatpush1.bf16.msra.mxu0 %v2323_v7 }
 0x665   :  { %1696 = vmatprep.subr.bf16.mxu0 %v2331_v9 }
 0x668   :  { %1697 = vmatpush1.bf16.msra.mxu0 %v2329_v15 }
 0x710   :  { %v2054_v17 = vpop.f32.mrb[24].mxu0  ;;  %v2088_v18 = vpop.f32.mrb[28].mxu1 }
 0x711   :  { %v2055_v20 = vpop.f32.mrb[25].mxu0  ;;  %v2089_v21 = vpop.f32.mrb[29].mxu1 }
 0x712   :  { %v2056_v22 = vadd.f32 %v2055_v20, %v2054_v17  ;;  %v2090_v23 = vadd.f32 %v2089_v21, %v2088_v18  ;;  %v2057_v24 = vpop.f32.mrb[26].mxu0  ;;  %v2091_v25 = vpop.f32.mrb[30].mxu1  ;;  %v2351_v20 = vmov 1966171168  }
 0x713   :  { %v2058_v26 = vpop.f32.mrb[27].mxu0  ;;  %v2092_v27 = vpop.f32.mrb[31].mxu1  ;;  %v1790_v21 = vunpack.c.l.s4 %v2351_v20 }
 0x714   :  { %v1377_v28 = vadd.f32 %v2056_v22, %v1941_v19  ;;  %v2059_v29 = vadd.f32 %v2058_v26, %v2057_v24  ;;  %v2093_v30 = vadd.f32 %v2092_v27, %v2091_v25 }
 0x715   :  { %v1791_v22 = vunpack.c.0.s8 %v1790_v21 }
 0x716   :  { %v1434_v31 = vadd.f32 %v2090_v23, %v1377_v28  ;;  %v1380_v32 = vadd.f32 %v2059_v29, %v1941_v19  ;;  %v2007_v23 = vld.sshfl [vmem:[%s2842_s12] sm:$0x33 pattern:$0x75316420] }
 0x717   :  { %v1788_v24 = vcombine.high %v2007_v23, %v2007_v23  ;;  %v1794_v25 = vsub.s32 %v1791_v22, %v2660_v52  ;;  %v1500_v28 = vld [vmem:[%s2843_s11] sm:$0xf] }
 0x718   :  { %v1437_v33 = vadd.f32 %v2093_v30, %v1380_v32  ;;  %v2060_v34 = vpop.f32.mrb[28].mxu0  ;;  %v2094_v35 = vpop.f32.mrb[32].mxu1  ;;  %v1456_v39 = vmax.f32 %v1434_v31, 0.0  ;;  %v1505_v29 = vrot.slane %v1500_v28, %v767_v63  ;;  %v1509_v30 = vrot.slane %v1500_v28, %v771_v4 }
 0x719   :  { %v2061_v36 = vpop.f32.mrb[29].mxu0  ;;  %v2095_v37 = vpop.f32.mrb[33].mxu1  ;;  %v1802_v26 = vrot.slane %v1788_v24, %v1794_v25  ;;  %v1517_v31 = vrot.slane %v1500_v28, %v779_v5  ;;  %v1513_v5 = vrot.slane %v1500_v28, %v775_v0 }
 0x71a   :  { %v1457_v40 = vmax.f32 %v1437_v33, 0.0  ;;  %v2062_v41 = vadd.f32 %v2061_v36, %v2060_v34  ;;  %v2096_v10 = vadd.f32 %v2095_v37, %v2094_v35  ;;  %v2063_v42 = vpop.f32.mrb[30].mxu0  ;;  %v2097_v11 = vpop.f32.mrb[34].mxu1 }
 0x71b   :  { %v2064_v12 = vpop.f32.mrb[31].mxu0  ;;  %v2098_v13 = vpop.f32.mrb[35].mxu1  ;;  %1809 = vmatprep.subr.bf16.mxu0 %v1802_v26  ;;  %v1804_v27 = vcombine.high %v1802_v26, %v1802_v26 }
 0x71c   :  { %v1462_v43 = vadd.f32 %v1457_v40, %v1456_v39  ;;  %v1385_v44 = vadd.f32 %v2062_v41, %v1941_v19  ;;  %v2065_v38 = vadd.f32 %v2064_v12, %v2063_v42  ;;  %v2099_v45 = vadd.f32 %v2098_v13, %v2097_v11 }
 0x71e   :  { %v1442_v46 = vadd.f32 %v2096_v10, %v1385_v44  ;;  %v1388_v47 = vadd.f32 %v2065_v38, %v1941_v19 }
 0x720   :  { %v1458_v48 = vmax.f32 %v1442_v46, 0.0  ;;  %v1445_v49 = vadd.f32 %v2099_v45, %v1388_v47  ;;  %v2066_v50 = vpop.f32.mrb[32].mxu0  ;;  %v2100_v51 = vpop.f32.mrb[36].mxu1  ;;  %v2006_v47 = vld [vmem:[%s2844_s13] ss:$0 sm:$0xff] }
 0x721   :  { %v2067_v53 = vpop.f32.mrb[33].mxu0  ;;  %v2101_v54 = vpop.f32.mrb[37].mxu1 }
 0x722   :  { %v1463_v55 = vadd.f32 %v1462_v43, %v1458_v48  ;;  %v1459_v56 = vmax.f32 %v1445_v49, 0.0  ;;  %v2068_v57 = vadd.f32 %v2067_v53, %v2066_v50  ;;  %v2102_v58 = vadd.f32 %v2101_v54, %v2100_v51  ;;  %v2069_v59 = vpop.f32.mrb[34].mxu0  ;;  %v2103_v60 = vpop.f32.mrb[38].mxu1 }
 0x723   :  { %v2070_v61 = vpop.f32.mrb[35].mxu0  ;;  %v2104_v62 = vpop.f32.mrb[39].mxu1 }
 0x724   :  { %v1464_v1 = vadd.f32 %v1463_v55, %v1459_v56  ;;  %v1393_v2 = vadd.f32 %v2068_v57, %v1941_v19  ;;  %v2071_v3 = vadd.f32 %v2070_v61, %v2069_v59  ;;  %v2105_v6 = vadd.f32 %v2104_v62, %v2103_v60 }
 0x726   :  { %v1450_v7 = vadd.f32 %v2102_v58, %v1393_v2  ;;  %v1396_v8 = vadd.f32 %v2071_v3, %v1941_v19  ;;  %v1795_v19 = vrot.slane %v2007_v23, %v1794_v25 }
 0x728   :  { %v1460_v9 = vmax.f32 %v1450_v7, 0.0  ;;  %v1453_v14 = vadd.f32 %v2105_v6, %v1396_v8  ;;  %v1803_v43 = vcombine.high %v1795_v19, %v1795_v19 }
 0x72a   :  { %v1465_v15 = vadd.f32 %v1464_v1, %v1460_v9  ;;  %v1461_v16 = vmax.f32 %v1453_v14, 0.0 }
 0x72c   :  { %v1466_v17 = vadd.f32 %v1465_v15, %v1461_v16 }
 0x72e   :  { %v1467_v18 = vpack.c.bf16 %v1466_v17, %v1466_v17 }
 0x730   :  { %1715 = vmatmul.mubr.bf16.vlgmr.msra.gmra.mrb[36].mxu0 %v1467_v18  ;;  %1756 = vmatmul.mubr.bf16.vlgmr.msra.gmra.mrb[40].mxu1 %v1467_v18 }
 0x731   :  { %1810 = vmatpush1.bf16.xpose.msra.mxu0 %v1795_v19 }
 0x732   :  { %1849 = vmatprep.subr.bf16.mxu0 %v1804_v27 }
 0x803   :  { %v1716_v32 = vpop.f32.mrb[36].mxu0  ;;  %v1757_v33 = vpop.f32.mrb[40].mxu1 }
 0x804   :  { %v1717_v34 = vadd.f32 %v1716_v32, %v1505_v29  ;;  %v1718_v35 = vpop.f32.mrb[37].mxu0  ;;  %v1759_v36 = vpop.f32.mrb[41].mxu1  ;;  %v1758_v38 = vadd.f32 %v1757_v33, %v1513_v5 }
 0x805   :  { %v1719_v37 = vadd.f32 %v1718_v35, %v1509_v30  ;;  %v1760_v39 = vadd.f32 %v1759_v36, %v1517_v31  ;;  %v1720_v40 = vpop.f32.mrb[38].mxu0  ;;  %v1761_v41 = vpop.f32.mrb[42].mxu1 }
 0x806   :  { %v1764_v10 = vmax.f32 %v1717_v34, 0.0  ;;  %v1721_v42 = vpop.f32.mrb[39].mxu0  ;;  %v1762_v11 = vpop.f32.mrb[43].mxu1  ;;  %v1766_v45 = vmax.f32 %v1758_v38, 0.0 }
 0x807   :  { %v1765_v12 = vmax.f32 %v1719_v37, 0.0  ;;  %v1767_v63 = vmax.f32 %v1760_v39, 0.0 }
 0x808   :  { %v1768_v4 = vpack.c.bf16 %v1764_v10, %v1764_v10  ;;  %v1770_v46 = vpack.c.bf16 %v1766_v45, %v1766_v45 }
 0x809   :  { %v1769_v13 = vpack.c.bf16 %v1765_v12, %v1765_v12  ;;  %v1771_v44 = vpack.c.bf16 %v1767_v63, %v1767_v63 }
 0x80b   :  { %1841 = vmatprep.mubr.bf16.mxu0 %v1769_v13 }
 0x80c   :  { %1842 = vmatmul.mubr.bf16.vlgmr.msra.gmra.mrb[40].mxu0 %v1768_v4 }
 0x80d   :  { %1850 = vmatpush1.bf16.xpose.msra.mxu0 %v1803_v43  ;;  %1881 = vmatprep.mubr.bf16.mxu0 %v1771_v44 }
 0x818   :  { %1882 = vmatmul.mubr.bf16.vlgmr.msra.gmra.mrb[40].mxu0 %v1770_v46 }
 0x8eb   :  { %v1883_v48 = vpop.f32.mrb[40].mxu0 }
 0x8ec   :  { %v2208_v49 = vadd.f32 %v2006_v47, %v1883_v48  ;;  %v1885_v50 = vpop.f32.mrb[41].mxu0 }
 0x8ed   :  { %v1886_v51 = vpop.f32.mrb[42].mxu0 }
 0x8ee   :  { %1890 = vst.msk [vmem:[%s2845_s14] sm:$0xff] %vm1889_vm6, %v2208_v49  ;;  %v1887_v52 = vpop.f32.mrb[43].mxu0 }

</bundles_post_ra>
